<compile_context>
chip_gen: v7x
topology: tpu7x:2x2x1
jax: 0.10.0
libtpu: 0.0.40
codegen_flags: <defaults>
</compile_context>

<pallas_src>
import functools

import jax
import jax.numpy as jnp
from jax.experimental import pallas as pl
from jax.experimental.pallas import tpu as pltpu


def _round_up(a, m):
    return ((a + m - 1) // m) * m


def _attention_kernel(xf_ref, xq_ref, wq_ref, wkv_ref, wo_ref, bproj_ref,
                      o_ref,
                      q_scr, k_scr, v_scr,
                      *, num_heads, head_dim):
    H, hd = num_heads, head_dim
    C = H * hd
    TQ = xq_ref.shape[1]
    qi = pl.program_id(1)

    # ---- K/V projection: once per batch element (first q-tile), persisted in
    #      VMEM scratch across the (arbitrary) q-tile axis.
    @pl.when(qi == 0)
    def _():
        xf = xf_ref[0]                                        # (N, C) bf16
        kv = jnp.dot(xf, wkv_ref[...],
                     preferred_element_type=jnp.float32)      # (N, 2C) f32
        kv = kv.astype(jnp.bfloat16)
        for h in range(H):
            k_scr[h] = kv[:, h * hd:(h + 1) * hd]             # (N, hd)
            v_scr[h] = kv[:, C + h * hd:C + (h + 1) * hd]     # (N, hd)

    # ---- Q projection for this q-tile (softmax scale pre-folded into W_q).
    xq = xq_ref[0]                                            # (TQ, C) bf16
    q2d = jnp.dot(xq, wq_ref[...],
                  preferred_element_type=jnp.float32).astype(jnp.bfloat16)
    for h in range(H):
        q_scr[h] = q2d[:, h * hd:(h + 1) * hd]                # (TQ, hd)

    q = q_scr[...]                                            # (H, TQ, hd) bf16
    k = k_scr[...]                                            # (H, N,  hd) bf16
    v = v_scr[...]                                            # (H, N,  hd) bf16

    # ---- Scores + softmax (f32 math; bf16 only at the MXU operands).
    s = jnp.einsum('hqd,hkd->hqk', q, k,
                   preferred_element_type=jnp.float32)        # (H, TQ, N)
    m = jnp.max(s, axis=-1, keepdims=True)
    p = jnp.exp(s - m)
    denom = jnp.sum(p, axis=-1, keepdims=True)                # (H, TQ, 1)
    ctx = jnp.einsum('hqk,hkd->hqd', p.astype(jnp.bfloat16), v,
                     preferred_element_type=jnp.float32)      # (H, TQ, hd)
    inv = pl.reciprocal(denom, approx=True)                   # EUP slot

    # ---- Output projection: per-head accumulation into (TQ, C), bias init.
    acc = jnp.broadcast_to(bproj_ref[...], (TQ, C))           # (TQ, C) f32
    for h in range(H):
        ch = (ctx[h] * inv[h]).astype(jnp.bfloat16)           # (TQ, hd)
        acc = acc + jnp.dot(ch, wo_ref[h],
                            preferred_element_type=jnp.float32)
    o_ref[0] = acc.astype(o_ref.dtype)


def attention_forward(x, w_qkv, w_proj, b_proj, num_heads, tq_target=256):
    """x: (B, N, C) f32. w_qkv: (C, 3C) (= W_qkv^T). w_proj: (C, C) (= W_proj^T).
    b_proj: (1, C). Returns (B, N, C) f32."""
    B, N, C = x.shape
    assert C % num_heads == 0
    hd = C // num_heads
    scale = hd ** (-0.5)

    # One-time wrapper-side prep: bf16 MXU operands, per-head proj weight
    # layout, softmax scale folded into W_q.
    wq = (w_qkv[:, :C] * scale).astype(jnp.bfloat16)               # (C, C)
    wkv = w_qkv[:, C:].astype(jnp.bfloat16)                        # (C, 2C)
    wo = w_proj.reshape(num_heads, hd, C).astype(jnp.bfloat16)     # (H, hd, C)
    bp = b_proj.reshape(1, C).astype(jnp.float32)                  # (1, C)
    xb = x.astype(jnp.bfloat16)                                    # (B, N, C)

    TQ = min(tq_target, _round_up(N, 8))
    n_q = pl.cdiv(N, TQ)

    kernel = functools.partial(_attention_kernel,
                               num_heads=num_heads, head_dim=hd)

    flops = 2 * B * (4 * N * C * C + 2 * N * N * C)
    transcendentals = B * num_heads * N * N
    bytes_accessed = (2 * B * N * C * 2) + (4 * C * C * 2 + 4 * C) + (B * N * C * 4)

    return pl.pallas_call(
        kernel,
        out_shape=jax.ShapeDtypeStruct((B, N, C), x.dtype),
        grid_spec=pltpu.PrefetchScalarGridSpec(
            num_scalar_prefetch=0,
            grid=(B, n_q),
            in_specs=[
                pl.BlockSpec((1, N, C), lambda b, i: (b, 0, 0)),        # x (full seq, K/V)
                pl.BlockSpec((1, TQ, C), lambda b, i: (b, i, 0)),       # x (q tile)
                pl.BlockSpec((C, C), lambda b, i: (0, 0)),              # W_q * scale
                pl.BlockSpec((C, 2 * C), lambda b, i: (0, 0)),          # W_kv
                pl.BlockSpec((num_heads, hd, C), lambda b, i: (0, 0, 0)),  # W_proj per head
                pl.BlockSpec((1, C), lambda b, i: (0, 0)),              # proj bias
            ],
            out_specs=pl.BlockSpec((1, TQ, C), lambda b, i: (b, i, 0)),
            scratch_shapes=[
                pltpu.VMEM((num_heads, TQ, hd), jnp.bfloat16),          # Q tile
                pltpu.VMEM((num_heads, N, hd), jnp.bfloat16),           # K (full seq)
                pltpu.VMEM((num_heads, N, hd), jnp.bfloat16),           # V (full seq)
            ],
        ),
        compiler_params=pltpu.CompilerParams(
            dimension_semantics=("parallel", "arbitrary"),
            vmem_limit_bytes=64 * 1024 * 1024,
        ),
        cost_estimate=pl.CostEstimate(
            flops=flops,
            transcendentals=transcendentals,
            bytes_accessed=bytes_accessed,
        ),
    )(xb, xb, wq, wkv, wo, bp)


def attention_reference(x, w_qkv, w_proj, b_proj, num_heads):
    """Plain-JAX (f32) reference mirroring the PyTorch forward (r_std == 0)."""
    B, N, C = x.shape
    hd = C // num_heads
    scale = hd ** (-0.5)
    qkv = x @ w_qkv                                          # (B, N, 3C)
    qkv = qkv.reshape(B, N, 3, num_heads, hd).transpose(2, 0, 3, 1, 4)
    q, k, v = qkv[0], qkv[1], qkv[2]                         # (B, H, N, hd)
    attn = (q @ jnp.swapaxes(k, -2, -1)) * scale             # (B, H, N, N)
    attn = jax.nn.softmax(attn, axis=-1)
    ctx = (attn @ v).transpose(0, 2, 1, 3).reshape(B, N, C)
    return ctx @ w_proj + b_proj


if __name__ == "__main__":
    # Small shapes consistent with the module
    B, N, C = 2, 8, 32
    num_heads = 4  # head_dim = 8

    key = jax.random.PRNGKey(0)
    kx, kqkv, kproj, kbias = jax.random.split(key, 4)

    x = jax.random.normal(kx, (B, N, C), dtype=jnp.float32)
    # nn.Linear(dim, 3*dim, bias=False): weight (3C, C); we store transposed (C, 3C)
    w_qkv = 0.05 * jax.random.normal(kqkv, (C, 3 * C), dtype=jnp.float32)
    # nn.Linear(dim, dim): weight (C, C) + bias (C,); store W^T (C, C), bias (1, C)
    w_proj = 0.05 * jax.random.normal(kproj, (C, C), dtype=jnp.float32)
    b_proj = 0.05 * jax.random.normal(kbias, (1, C), dtype=jnp.float32)

    out = attention_forward(x, w_qkv, w_proj, b_proj, num_heads)
    out = jax.block_until_ready(out)

    ref = attention_reference(x, w_qkv, w_proj, b_proj, num_heads)
    # bf16 MXU operands + approx reciprocal -> looser tolerance than f32.
    if not jnp.allclose(out, ref, atol=2e-2, rtol=2e-2):
        raise AssertionError("Pallas attention mismatch vs JAX reference")

    print("KERNEL_OK")
</pallas_src>

<mosaic_0001>
module attributes {stable_mosaic.version = 11 : i64} {
  func.func @_attention_kernel(%arg0: i32, %arg1: i32, %arg2: memref<1x8x32xbf16, #tpu.memory_space<vmem>>, %arg3: memref<1x8x32xbf16, #tpu.memory_space<vmem>>, %arg4: memref<32x32xbf16, #tpu.memory_space<vmem>>, %arg5: memref<32x64xbf16, #tpu.memory_space<vmem>>, %arg6: memref<4x8x32xbf16, #tpu.memory_space<vmem>>, %arg7: memref<1x32xf32, #tpu.memory_space<vmem>>, %arg8: memref<1x8x32xf32, #tpu.memory_space<vmem>>, %arg9: memref<4x8x8xbf16, #tpu.memory_space<vmem>>, %arg10: memref<4x8x8xbf16, #tpu.memory_space<vmem>>, %arg11: memref<4x8x8xbf16, #tpu.memory_space<vmem>>) attributes {dimension_semantics = [#tpu.dimension_semantics<parallel>, #tpu.dimension_semantics<arbitrary>], iteration_bounds = array<i64: 2, 1>, scalar_prefetch = 0 : i64, scratch_operands = 3 : i64, tpu.core_type = #tpu.core_type<tc>, window_params = [{transform_indices = @transform_0, window_bounds = array<i64: 1, 8, 32>}, {transform_indices = @transform_1, window_bounds = array<i64: 1, 8, 32>}, {pipeline_mode = #tpu.pipeline_mode<synchronous>, transform_indices = @transform_2, window_bounds = array<i64: 32, 32>}, {pipeline_mode = #tpu.pipeline_mode<synchronous>, transform_indices = @transform_3, window_bounds = array<i64: 32, 64>}, {pipeline_mode = #tpu.pipeline_mode<synchronous>, transform_indices = @transform_4, window_bounds = array<i64: 4, 8, 32>}, {pipeline_mode = #tpu.pipeline_mode<synchronous>, transform_indices = @transform_5, window_bounds = array<i64: 1, 32>}, {transform_indices = @transform_6, window_bounds = array<i64: 1, 8, 32>}]} {
    %c0_i32 = arith.constant 0 : i32
    %0 = arith.cmpi eq, %arg1, %c0_i32 : i32
    %1 = arith.extui %0 : i1 to i32
    %c0_i32_0 = arith.constant 0 : i32
    %2 = arith.cmpi ne, %1, %c0_i32_0 : i32
    scf.if %2 {
      %c0_48 = arith.constant 0 : index
      %c0_49 = arith.constant 0 : index
      %c0_50 = arith.constant 0 : index
      %88 = vector.load %arg2[%c0_48, %c0_49, %c0_50] : memref<1x8x32xbf16, #tpu.memory_space<vmem>>, vector<1x8x32xbf16>
      %89 = vector.shape_cast %88 : vector<1x8x32xbf16> to vector<8x32xbf16>
      %c0_51 = arith.constant 0 : index
      %c0_52 = arith.constant 0 : index
      %90 = vector.load %arg5[%c0_51, %c0_52] : memref<32x64xbf16, #tpu.memory_space<vmem>>, vector<32x64xbf16>
      %cst_53 = arith.constant dense<0.000000e+00> : vector<8x64xf32>
      %91 = tpu.matmul %89, %90, %cst_53 {dimension_numbers = #tpu.dot_dimension_numbers<[1], [0], [0], [1], [0, 0, 1, 1], [], []>} : vector<8x32xbf16>, vector<32x64xbf16>, vector<8x64xf32> -> vector<8x64xf32>
      %92 = arith.truncf %91 : vector<8x64xf32> to vector<8x64xbf16>
      %93 = vector.extract_strided_slice %92 {offsets = [0, 0], sizes = [8, 8], strides = [1, 1]} : vector<8x64xbf16> to vector<8x8xbf16>
      %c0_54 = arith.constant 0 : index
      %c0_55 = arith.constant 0 : index
      %c0_56 = arith.constant 0 : index
      %94 = vector.load %arg10[%c0_54, %c0_55, %c0_56] : memref<4x8x8xbf16, #tpu.memory_space<vmem>>, vector<1x8x8xbf16>
      %95 = vector.shape_cast %94 : vector<1x8x8xbf16> to vector<8x8xbf16>
      %96 = vector.shape_cast %93 : vector<8x8xbf16> to vector<1x8x8xbf16>
      tpu.vector_store %arg10[%c0_54, %c0_55, %c0_56], %96 {strides = array<i32>} : memref<4x8x8xbf16, #tpu.memory_space<vmem>>, vector<1x8x8xbf16>,
      %97 = vector.extract_strided_slice %92 {offsets = [0, 32], sizes = [8, 8], strides = [1, 1]} : vector<8x64xbf16> to vector<8x8xbf16>
      %c0_57 = arith.constant 0 : index
      %c0_58 = arith.constant 0 : index
      %c0_59 = arith.constant 0 : index
      %98 = vector.load %arg11[%c0_57, %c0_58, %c0_59] : memref<4x8x8xbf16, #tpu.memory_space<vmem>>, vector<1x8x8xbf16>
      %99 = vector.shape_cast %98 : vector<1x8x8xbf16> to vector<8x8xbf16>
      %100 = vector.shape_cast %97 : vector<8x8xbf16> to vector<1x8x8xbf16>
      tpu.vector_store %arg11[%c0_57, %c0_58, %c0_59], %100 {strides = array<i32>} : memref<4x8x8xbf16, #tpu.memory_space<vmem>>, vector<1x8x8xbf16>,
      %101 = vector.extract_strided_slice %92 {offsets = [0, 8], sizes = [8, 8], strides = [1, 1]} : vector<8x64xbf16> to vector<8x8xbf16>
      %c1_60 = arith.constant 1 : index
      %c0_61 = arith.constant 0 : index
      %c0_62 = arith.constant 0 : index
      %102 = vector.load %arg10[%c1_60, %c0_61, %c0_62] : memref<4x8x8xbf16, #tpu.memory_space<vmem>>, vector<1x8x8xbf16>
      %103 = vector.shape_cast %102 : vector<1x8x8xbf16> to vector<8x8xbf16>
      %104 = vector.shape_cast %101 : vector<8x8xbf16> to vector<1x8x8xbf16>
      tpu.vector_store %arg10[%c1_60, %c0_61, %c0_62], %104 {strides = array<i32>} : memref<4x8x8xbf16, #tpu.memory_space<vmem>>, vector<1x8x8xbf16>,
      %105 = vector.extract_strided_slice %92 {offsets = [0, 40], sizes = [8, 8], strides = [1, 1]} : vector<8x64xbf16> to vector<8x8xbf16>
      %c1_63 = arith.constant 1 : index
      %c0_64 = arith.constant 0 : index
      %c0_65 = arith.constant 0 : index
      %106 = vector.load %arg11[%c1_63, %c0_64, %c0_65] : memref<4x8x8xbf16, #tpu.memory_space<vmem>>, vector<1x8x8xbf16>
      %107 = vector.shape_cast %106 : vector<1x8x8xbf16> to vector<8x8xbf16>
      %108 = vector.shape_cast %105 : vector<8x8xbf16> to vector<1x8x8xbf16>
      tpu.vector_store %arg11[%c1_63, %c0_64, %c0_65], %108 {strides = array<i32>} : memref<4x8x8xbf16, #tpu.memory_space<vmem>>, vector<1x8x8xbf16>,
      %109 = vector.extract_strided_slice %92 {offsets = [0, 16], sizes = [8, 8], strides = [1, 1]} : vector<8x64xbf16> to vector<8x8xbf16>
      %c2_66 = arith.constant 2 : index
      %c0_67 = arith.constant 0 : index
      %c0_68 = arith.constant 0 : index
      %110 = vector.load %arg10[%c2_66, %c0_67, %c0_68] : memref<4x8x8xbf16, #tpu.memory_space<vmem>>, vector<1x8x8xbf16>
      %111 = vector.shape_cast %110 : vector<1x8x8xbf16> to vector<8x8xbf16>
      %112 = vector.shape_cast %109 : vector<8x8xbf16> to vector<1x8x8xbf16>
      tpu.vector_store %arg10[%c2_66, %c0_67, %c0_68], %112 {strides = array<i32>} : memref<4x8x8xbf16, #tpu.memory_space<vmem>>, vector<1x8x8xbf16>,
      %113 = vector.extract_strided_slice %92 {offsets = [0, 48], sizes = [8, 8], strides = [1, 1]} : vector<8x64xbf16> to vector<8x8xbf16>
      %c2_69 = arith.constant 2 : index
      %c0_70 = arith.constant 0 : index
      %c0_71 = arith.constant 0 : index
      %114 = vector.load %arg11[%c2_69, %c0_70, %c0_71] : memref<4x8x8xbf16, #tpu.memory_space<vmem>>, vector<1x8x8xbf16>
      %115 = vector.shape_cast %114 : vector<1x8x8xbf16> to vector<8x8xbf16>
      %116 = vector.shape_cast %113 : vector<8x8xbf16> to vector<1x8x8xbf16>
      tpu.vector_store %arg11[%c2_69, %c0_70, %c0_71], %116 {strides = array<i32>} : memref<4x8x8xbf16, #tpu.memory_space<vmem>>, vector<1x8x8xbf16>,
      %117 = vector.extract_strided_slice %92 {offsets = [0, 24], sizes = [8, 8], strides = [1, 1]} : vector<8x64xbf16> to vector<8x8xbf16>
      %c3_72 = arith.constant 3 : index
      %c0_73 = arith.constant 0 : index
      %c0_74 = arith.constant 0 : index
      %118 = vector.load %arg10[%c3_72, %c0_73, %c0_74] : memref<4x8x8xbf16, #tpu.memory_space<vmem>>, vector<1x8x8xbf16>
      %119 = vector.shape_cast %118 : vector<1x8x8xbf16> to vector<8x8xbf16>
      %120 = vector.shape_cast %117 : vector<8x8xbf16> to vector<1x8x8xbf16>
      tpu.vector_store %arg10[%c3_72, %c0_73, %c0_74], %120 {strides = array<i32>} : memref<4x8x8xbf16, #tpu.memory_space<vmem>>, vector<1x8x8xbf16>,
      %121 = vector.extract_strided_slice %92 {offsets = [0, 56], sizes = [8, 8], strides = [1, 1]} : vector<8x64xbf16> to vector<8x8xbf16>
      %c3_75 = arith.constant 3 : index
      %c0_76 = arith.constant 0 : index
      %c0_77 = arith.constant 0 : index
      %122 = vector.load %arg11[%c3_75, %c0_76, %c0_77] : memref<4x8x8xbf16, #tpu.memory_space<vmem>>, vector<1x8x8xbf16>
      %123 = vector.shape_cast %122 : vector<1x8x8xbf16> to vector<8x8xbf16>
      %124 = vector.shape_cast %121 : vector<8x8xbf16> to vector<1x8x8xbf16>
      tpu.vector_store %arg11[%c3_75, %c0_76, %c0_77], %124 {strides = array<i32>} : memref<4x8x8xbf16, #tpu.memory_space<vmem>>, vector<1x8x8xbf16>,
    } else {
    }
    %c0 = arith.constant 0 : index
    %c0_1 = arith.constant 0 : index
    %c0_2 = arith.constant 0 : index
    %3 = vector.load %arg3[%c0, %c0_1, %c0_2] : memref<1x8x32xbf16, #tpu.memory_space<vmem>>, vector<1x8x32xbf16>
    %4 = vector.shape_cast %3 : vector<1x8x32xbf16> to vector<8x32xbf16>
    %c0_3 = arith.constant 0 : index
    %c0_4 = arith.constant 0 : index
    %5 = vector.load %arg4[%c0_3, %c0_4] : memref<32x32xbf16, #tpu.memory_space<vmem>>, vector<32x32xbf16>
    %cst = arith.constant dense<0.000000e+00> : vector<8x32xf32>
    %6 = tpu.matmul %4, %5, %cst {dimension_numbers = #tpu.dot_dimension_numbers<[1], [0], [0], [1], [0, 0, 1, 1], [], []>} : vector<8x32xbf16>, vector<32x32xbf16>, vector<8x32xf32> -> vector<8x32xf32>
    %7 = arith.truncf %6 : vector<8x32xf32> to vector<8x32xbf16>
    %8 = vector.extract_strided_slice %7 {offsets = [0, 0], sizes = [8, 8], strides = [1, 1]} : vector<8x32xbf16> to vector<8x8xbf16>
    %c0_5 = arith.constant 0 : index
    %c0_6 = arith.constant 0 : index
    %c0_7 = arith.constant 0 : index
    %9 = vector.load %arg9[%c0_5, %c0_6, %c0_7] : memref<4x8x8xbf16, #tpu.memory_space<vmem>>, vector<1x8x8xbf16>
    %10 = vector.shape_cast %9 : vector<1x8x8xbf16> to vector<8x8xbf16>
    %11 = vector.shape_cast %8 : vector<8x8xbf16> to vector<1x8x8xbf16>
    tpu.vector_store %arg9[%c0_5, %c0_6, %c0_7], %11 {strides = array<i32>} : memref<4x8x8xbf16, #tpu.memory_space<vmem>>, vector<1x8x8xbf16>,
    %12 = vector.extract_strided_slice %7 {offsets = [0, 8], sizes = [8, 8], strides = [1, 1]} : vector<8x32xbf16> to vector<8x8xbf16>
    %c1 = arith.constant 1 : index
    %c0_8 = arith.constant 0 : index
    %c0_9 = arith.constant 0 : index
    %13 = vector.load %arg9[%c1, %c0_8, %c0_9] : memref<4x8x8xbf16, #tpu.memory_space<vmem>>, vector<1x8x8xbf16>
    %14 = vector.shape_cast %13 : vector<1x8x8xbf16> to vector<8x8xbf16>
    %15 = vector.shape_cast %12 : vector<8x8xbf16> to vector<1x8x8xbf16>
    tpu.vector_store %arg9[%c1, %c0_8, %c0_9], %15 {strides = array<i32>} : memref<4x8x8xbf16, #tpu.memory_space<vmem>>, vector<1x8x8xbf16>,
    %16 = vector.extract_strided_slice %7 {offsets = [0, 16], sizes = [8, 8], strides = [1, 1]} : vector<8x32xbf16> to vector<8x8xbf16>
    %c2 = arith.constant 2 : index
    %c0_10 = arith.constant 0 : index
    %c0_11 = arith.constant 0 : index
    %17 = vector.load %arg9[%c2, %c0_10, %c0_11] : memref<4x8x8xbf16, #tpu.memory_space<vmem>>, vector<1x8x8xbf16>
    %18 = vector.shape_cast %17 : vector<1x8x8xbf16> to vector<8x8xbf16>
    %19 = vector.shape_cast %16 : vector<8x8xbf16> to vector<1x8x8xbf16>
    tpu.vector_store %arg9[%c2, %c0_10, %c0_11], %19 {strides = array<i32>} : memref<4x8x8xbf16, #tpu.memory_space<vmem>>, vector<1x8x8xbf16>,
    %20 = vector.extract_strided_slice %7 {offsets = [0, 24], sizes = [8, 8], strides = [1, 1]} : vector<8x32xbf16> to vector<8x8xbf16>
    %c3 = arith.constant 3 : index
    %c0_12 = arith.constant 0 : index
    %c0_13 = arith.constant 0 : index
    %21 = vector.load %arg9[%c3, %c0_12, %c0_13] : memref<4x8x8xbf16, #tpu.memory_space<vmem>>, vector<1x8x8xbf16>
    %22 = vector.shape_cast %21 : vector<1x8x8xbf16> to vector<8x8xbf16>
    %23 = vector.shape_cast %20 : vector<8x8xbf16> to vector<1x8x8xbf16>
    tpu.vector_store %arg9[%c3, %c0_12, %c0_13], %23 {strides = array<i32>} : memref<4x8x8xbf16, #tpu.memory_space<vmem>>, vector<1x8x8xbf16>,
    %c0_14 = arith.constant 0 : index
    %c0_15 = arith.constant 0 : index
    %c0_16 = arith.constant 0 : index
    %24 = vector.load %arg9[%c0_14, %c0_15, %c0_16] : memref<4x8x8xbf16, #tpu.memory_space<vmem>>, vector<4x8x8xbf16>
    %c0_17 = arith.constant 0 : index
    %c0_18 = arith.constant 0 : index
    %c0_19 = arith.constant 0 : index
    %25 = vector.load %arg10[%c0_17, %c0_18, %c0_19] : memref<4x8x8xbf16, #tpu.memory_space<vmem>>, vector<4x8x8xbf16>
    %c0_20 = arith.constant 0 : index
    %c0_21 = arith.constant 0 : index
    %c0_22 = arith.constant 0 : index
    %26 = vector.load %arg11[%c0_20, %c0_21, %c0_22] : memref<4x8x8xbf16, #tpu.memory_space<vmem>>, vector<4x8x8xbf16>
    "tpu.trace_start"() <{level = 10 : i32, message = "hqd,hkd->hqk"}> : () -> ()
    %cst_23 = arith.constant dense<0.000000e+00> : vector<4x8x8xf32>
    %27 = tpu.matmul %24, %25, %cst_23 {dimension_numbers = #tpu.dot_dimension_numbers<[2], [2], [1], [1], [0, 0, 0, 1, 1, 1], [0], [0]>} : vector<4x8x8xbf16>, vector<4x8x8xbf16>, vector<4x8x8xf32> -> vector<4x8x8xf32>
    "tpu.trace_stop"() : () -> ()
    %cst_24 = arith.constant dense<0xFF800000> : vector<4x8xf32>
    %28 = vector.multi_reduction <maximumf>, %27, %cst_24 [2] : vector<4x8x8xf32> to vector<4x8xf32>
    %29 = vector.shape_cast %28 : vector<4x8xf32> to vector<4x8x1xf32>
    %30 = vector.broadcast %29 : vector<4x8x1xf32> to vector<4x8x8xf32>
    %31 = arith.subf %27, %30 : vector<4x8x8xf32>
    %32 = math.exp %31 : vector<4x8x8xf32>
    %cst_25 = arith.constant dense<0.000000e+00> : vector<4x8xf32>
    %33 = vector.multi_reduction <add>, %32, %cst_25 [2] : vector<4x8x8xf32> to vector<4x8xf32>
    %34 = vector.shape_cast %33 : vector<4x8xf32> to vector<4x8x1xf32>
    %35 = arith.truncf %32 : vector<4x8x8xf32> to vector<4x8x8xbf16>
    "tpu.trace_start"() <{level = 10 : i32, message = "hqk,hkd->hqd"}> : () -> ()
    %cst_26 = arith.constant dense<0.000000e+00> : vector<4x8x8xf32>
    %36 = tpu.matmul %35, %26, %cst_26 {dimension_numbers = #tpu.dot_dimension_numbers<[2], [1], [1], [2], [0, 0, 0, 1, 1, 2], [0], [0]>} : vector<4x8x8xbf16>, vector<4x8x8xbf16>, vector<4x8x8xf32> -> vector<4x8x8xf32>
    "tpu.trace_stop"() : () -> ()
    %37 = tpu.reciprocal %34 {approx = true} : vector<4x8x1xf32> -> vector<4x8x1xf32>
    %c0_27 = arith.constant 0 : index
    %c0_28 = arith.constant 0 : index
    %38 = vector.load %arg7[%c0_27, %c0_28] : memref<1x32xf32, #tpu.memory_space<vmem>>, vector<1x32xf32>
    %39 = vector.shape_cast %38 : vector<1x32xf32> to vector<1x32xf32>
    %40 = vector.broadcast %39 : vector<1x32xf32> to vector<8x32xf32>
    %41 = vector.extract_strided_slice %36 {offsets = [0, 0, 0], sizes = [1, 8, 8], strides = [1, 1, 1]} : vector<4x8x8xf32> to vector<1x8x8xf32>
    %42 = vector.shape_cast %41 : vector<1x8x8xf32> to vector<8x8xf32>
    %43 = vector.extract_strided_slice %37 {offsets = [0, 0, 0], sizes = [1, 8, 1], strides = [1, 1, 1]} : vector<4x8x1xf32> to vector<1x8x1xf32>
    %44 = vector.shape_cast %43 : vector<1x8x1xf32> to vector<8x1xf32>
    %45 = vector.broadcast %44 : vector<8x1xf32> to vector<8x8xf32>
    %46 = arith.mulf %42, %45 : vector<8x8xf32>
    %47 = arith.truncf %46 : vector<8x8xf32> to vector<8x8xbf16>
    %c0_29 = arith.constant 0 : index
    %c0_30 = arith.constant 0 : index
    %c0_31 = arith.constant 0 : index
    %48 = vector.load %arg6[%c0_29, %c0_30, %c0_31] : memref<4x8x32xbf16, #tpu.memory_space<vmem>>, vector<1x8x32xbf16>
    %49 = vector.shape_cast %48 : vector<1x8x32xbf16> to vector<8x32xbf16>
    %cst_32 = arith.constant dense<0.000000e+00> : vector<8x32xf32>
    %50 = tpu.matmul %47, %49, %cst_32 {dimension_numbers = #tpu.dot_dimension_numbers<[1], [0], [0], [1], [0, 0, 1, 1], [], []>} : vector<8x8xbf16>, vector<8x32xbf16>, vector<8x32xf32> -> vector<8x32xf32>
    %51 = arith.addf %40, %50 : vector<8x32xf32>
    %52 = vector.extract_strided_slice %36 {offsets = [1, 0, 0], sizes = [1, 8, 8], strides = [1, 1, 1]} : vector<4x8x8xf32> to vector<1x8x8xf32>
    %53 = vector.shape_cast %52 : vector<1x8x8xf32> to vector<8x8xf32>
    %54 = vector.extract_strided_slice %37 {offsets = [1, 0, 0], sizes = [1, 8, 1], strides = [1, 1, 1]} : vector<4x8x1xf32> to vector<1x8x1xf32>
    %55 = vector.shape_cast %54 : vector<1x8x1xf32> to vector<8x1xf32>
    %56 = vector.broadcast %55 : vector<8x1xf32> to vector<8x8xf32>
    %57 = arith.mulf %53, %56 : vector<8x8xf32>
    %58 = arith.truncf %57 : vector<8x8xf32> to vector<8x8xbf16>
    %c1_33 = arith.constant 1 : index
    %c0_34 = arith.constant 0 : index
    %c0_35 = arith.constant 0 : index
    %59 = vector.load %arg6[%c1_33, %c0_34, %c0_35] : memref<4x8x32xbf16, #tpu.memory_space<vmem>>, vector<1x8x32xbf16>
    %60 = vector.shape_cast %59 : vector<1x8x32xbf16> to vector<8x32xbf16>
    %cst_36 = arith.constant dense<0.000000e+00> : vector<8x32xf32>
    %61 = tpu.matmul %58, %60, %cst_36 {dimension_numbers = #tpu.dot_dimension_numbers<[1], [0], [0], [1], [0, 0, 1, 1], [], []>} : vector<8x8xbf16>, vector<8x32xbf16>, vector<8x32xf32> -> vector<8x32xf32>
    %62 = arith.addf %51, %61 : vector<8x32xf32>
    %63 = vector.extract_strided_slice %36 {offsets = [2, 0, 0], sizes = [1, 8, 8], strides = [1, 1, 1]} : vector<4x8x8xf32> to vector<1x8x8xf32>
    %64 = vector.shape_cast %63 : vector<1x8x8xf32> to vector<8x8xf32>
    %65 = vector.extract_strided_slice %37 {offsets = [2, 0, 0], sizes = [1, 8, 1], strides = [1, 1, 1]} : vector<4x8x1xf32> to vector<1x8x1xf32>
    %66 = vector.shape_cast %65 : vector<1x8x1xf32> to vector<8x1xf32>
    %67 = vector.broadcast %66 : vector<8x1xf32> to vector<8x8xf32>
    %68 = arith.mulf %64, %67 : vector<8x8xf32>
    %69 = arith.truncf %68 : vector<8x8xf32> to vector<8x8xbf16>
    %c2_37 = arith.constant 2 : index
    %c0_38 = arith.constant 0 : index
    %c0_39 = arith.constant 0 : index
    %70 = vector.load %arg6[%c2_37, %c0_38, %c0_39] : memref<4x8x32xbf16, #tpu.memory_space<vmem>>, vector<1x8x32xbf16>
    %71 = vector.shape_cast %70 : vector<1x8x32xbf16> to vector<8x32xbf16>
    %cst_40 = arith.constant dense<0.000000e+00> : vector<8x32xf32>
    %72 = tpu.matmul %69, %71, %cst_40 {dimension_numbers = #tpu.dot_dimension_numbers<[1], [0], [0], [1], [0, 0, 1, 1], [], []>} : vector<8x8xbf16>, vector<8x32xbf16>, vector<8x32xf32> -> vector<8x32xf32>
    %73 = arith.addf %62, %72 : vector<8x32xf32>
    %74 = vector.extract_strided_slice %36 {offsets = [3, 0, 0], sizes = [1, 8, 8], strides = [1, 1, 1]} : vector<4x8x8xf32> to vector<1x8x8xf32>
    %75 = vector.shape_cast %74 : vector<1x8x8xf32> to vector<8x8xf32>
    %76 = vector.extract_strided_slice %37 {offsets = [3, 0, 0], sizes = [1, 8, 1], strides = [1, 1, 1]} : vector<4x8x1xf32> to vector<1x8x1xf32>
    %77 = vector.shape_cast %76 : vector<1x8x1xf32> to vector<8x1xf32>
    %78 = vector.broadcast %77 : vector<8x1xf32> to vector<8x8xf32>
    %79 = arith.mulf %75, %78 : vector<8x8xf32>
    %80 = arith.truncf %79 : vector<8x8xf32> to vector<8x8xbf16>
    %c3_41 = arith.constant 3 : index
    %c0_42 = arith.constant 0 : index
    %c0_43 = arith.constant 0 : index
    %81 = vector.load %arg6[%c3_41, %c0_42, %c0_43] : memref<4x8x32xbf16, #tpu.memory_space<vmem>>, vector<1x8x32xbf16>
    %82 = vector.shape_cast %81 : vector<1x8x32xbf16> to vector<8x32xbf16>
    %cst_44 = arith.constant dense<0.000000e+00> : vector<8x32xf32>
    %83 = tpu.matmul %80, %82, %cst_44 {dimension_numbers = #tpu.dot_dimension_numbers<[1], [0], [0], [1], [0, 0, 1, 1], [], []>} : vector<8x8xbf16>, vector<8x32xbf16>, vector<8x32xf32> -> vector<8x32xf32>
    %84 = arith.addf %73, %83 : vector<8x32xf32>
    %c0_45 = arith.constant 0 : index
    %c0_46 = arith.constant 0 : index
    %c0_47 = arith.constant 0 : index
    %85 = vector.load %arg8[%c0_45, %c0_46, %c0_47] : memref<1x8x32xf32, #tpu.memory_space<vmem>>, vector<1x8x32xf32>
    %86 = vector.shape_cast %85 : vector<1x8x32xf32> to vector<8x32xf32>
    %87 = vector.shape_cast %84 : vector<8x32xf32> to vector<1x8x32xf32>
    tpu.vector_store %arg8[%c0_45, %c0_46, %c0_47], %87 {strides = array<i32>} : memref<1x8x32xf32, #tpu.memory_space<vmem>>, vector<1x8x32xf32>,
    return
  }
  func.func @transform_0(%arg0: i32, %arg1: i32) -> (i32, i32, i32) {
    %c0_i32 = arith.constant 0 : i32
    %c0_i32_0 = arith.constant 0 : i32
    %c0_i32_1 = arith.constant 0 : i32
    return %arg0, %c0_i32, %c0_i32_0 : i32, i32, i32
  }
  func.func @transform_1(%arg0: i32, %arg1: i32) -> (i32, i32, i32) {
    %c0_i32 = arith.constant 0 : i32
    %c0_i32_0 = arith.constant 0 : i32
    return %arg0, %arg1, %c0_i32 : i32, i32, i32
  }
  func.func @transform_2(%arg0: i32, %arg1: i32) -> (i32, i32) {
    %c0_i32 = arith.constant 0 : i32
    %c0_i32_0 = arith.constant 0 : i32
    %c0_i32_1 = arith.constant 0 : i32
    return %c0_i32, %c0_i32_0 : i32, i32
  }
  func.func @transform_3(%arg0: i32, %arg1: i32) -> (i32, i32) {
    %c0_i32 = arith.constant 0 : i32
    %c0_i32_0 = arith.constant 0 : i32
    %c0_i32_1 = arith.constant 0 : i32
    return %c0_i32, %c0_i32_0 : i32, i32
  }
  func.func @transform_4(%arg0: i32, %arg1: i32) -> (i32, i32, i32) {
    %c0_i32 = arith.constant 0 : i32
    %c0_i32_0 = arith.constant 0 : i32
    %c0_i32_1 = arith.constant 0 : i32
    %c0_i32_2 = arith.constant 0 : i32
    return %c0_i32, %c0_i32_0, %c0_i32_1 : i32, i32, i32
  }
  func.func @transform_5(%arg0: i32, %arg1: i32) -> (i32, i32) {
    %c0_i32 = arith.constant 0 : i32
    %c0_i32_0 = arith.constant 0 : i32
    %c0_i32_1 = arith.constant 0 : i32
    return %c0_i32, %c0_i32_0 : i32, i32
  }
  func.func @transform_6(%arg0: i32, %arg1: i32) -> (i32, i32, i32) {
    %c0_i32 = arith.constant 0 : i32
    %c0_i32_0 = arith.constant 0 : i32
    return %arg0, %arg1, %c0_i32 : i32, i32, i32
  }
}

</mosaic_0001>

<bundles_post_ra>
// kernel: tpu_custom_call.1
= control target key start
LH: loop header
LB: loop body
LE: loop exit
PB: predicated region body
PF: predicated region fallthrough
CT: control target
= control target key end

     0   :  { %s2440_s0 = inlined_call_operand.hbm [shape: bf16[2,8,32], index: 0, kind: input, shape index: {}]   ;;  %s2441_s1 = inlined_call_operand.hbm [shape: bf16[2,8,32], index: 1, kind: input, shape index: {}]   ;;  %s2442_s2 = inlined_call_operand.hbm [shape: bf16[32,32], index: 2, kind: input, shape index: {}]   ;;  %s2443_s3 = inlined_call_operand.hbm [shape: bf16[32,64], index: 3, kind: input, shape index: {}]   ;;  %s2444_s4 = inlined_call_operand.hbm [shape: bf16[4,8,32], index: 4, kind: input, shape index: {}]   ;;  %s2445_s5 = inlined_call_operand.hbm [shape: f32[1,32], index: 5, kind: input, shape index: {}]   ;;  %s2446_s6 = inlined_call_operand.hbm [shape: f32[2,8,32], index: 6, kind: output, shape index: {}]  }
   0x1   :  { %2452 = sst [smem:[#allocation24_spill]] %s2442_s2 }
   0x2   :  { %2453 = sst [smem:[#allocation25_spill]] %s2443_s3 }
   0x3   :  { %2454 = sst [smem:[#allocation26_spill]] %s2444_s4 }
   0x4   :  { %2455 = sst [smem:[#allocation27_spill]] %s2445_s5 }
   0x5   :  { %11 = vsyncpa [#allocation6], 0 }
   0x6   :  { %13 = vsyncpa [#allocation6 + $0x1], 0 }
   0x7   :  { %14 = vsyncpa [#allocation9], 0 }
   0x8   :  { %16 = vsyncpa [#allocation9 + $0x1], 0 }
   0x9   :  { %17 = vsyncpa [#allocation12], 0 }
   0xa   :  { %18 = vsyncpa [#allocation15], 0 }
   0xb   :  { %19 = vsyncpa [#allocation7], 0 }
   0xc   :  { %21 = vsyncpa [#allocation7 + $0x1], 0  ;;  %s2000_s21 = smov 0   ;;  %s2002_s22 = smov 0  }
   0xd   :  { %s2004_s23 = smov 0   ;;  %s2006_s24 = smov 0  }
   0xe   :  { %s2008_s25 = smov 0   ;;  %s2010_s26 = smov 0  }
   0xf LB: > { %s2031_s27 = sadd.s32 4294967295, %s1945_s26   ;;  %p1360_p0 = scmp.ge.s32.totalorder %s1945_s26, 1  ;;  %s1945_s26 = sphi %s2010_s26, %s27_s26   ;;  %s1941_s25 = sphi %s2008_s25, %s2486_s25   ;;  %s1937_s24 = sphi %s2006_s24, %s2485_s24   ;;  %s1933_s23 = sphi %s2004_s23, %s2484_s23   ;;  %s1929_s22 = sphi %s2002_s22, %s2483_s22   ;;  %s1925_s21 = sphi %s2000_s21, %s2482_s21  }
  0x10   : > { %p2447_p1 = scmp.eq.s32.totalorder %s2031_s27, 0  ;;  %p210_p2 = scmp.lt.s32.totalorder %s1945_s26, 3 }
  0x11   : > { %s1947_s29 = smov [#allocation10]   ;;  %s1948_s8 = smov [#allocation11]  }
  0x12   : > { %p2036_p3 = pnand %p1360_p0, %p210_p2  ;;  %s222_s30 = sshll.u32 %s1947_s29, 4  ;;  %s2040_s30 = int_to_ptr.vmem [resolvable:$true] %s222_s30 }
  0x13   : > { %s235_s9 = sshll.u32 %s1948_s8, 4  ;;  %s1949_s10 = smov [#allocation13]   ;;  %s2051_s9 = int_to_ptr.vmem [resolvable:$true] %s235_s9 }
  0x14   : > { %s2456_s28 = scalar_select %p2036_p3, 1, 0 }
  0x15   : > { %p1558_p4 = pneg %p2036_p3  ;;  %s2053_s11 = sshll.u32 %s1949_s10, 4  ;;  %s249_s11 = int_to_ptr.vmem [resolvable:$true] %s2053_s11 }
  0x16   : > { %s2458_s2 = sld [smem:[#allocation24_spill]] }
  0x17   : > { %p2047_p6 = pnand %p1558_p4, %p2447_p1 }
  0x19   : > { %p2063_p8 = pneg %p2047_p6 }
  0x1c   : > { %s1675_s14 = scalar_lea.hbm %s2458_s2, 256 }
  0x1d   : > { %p1676_p7 = scmp.ne.s32.totalorder %s2458_s2, %s1675_s14  ;;  %p1682_p11 = scmp.lt.u32.totalorder %s1675_s14, %s2458_s2 }
  0x1f   : > { %p1678_p9 = pnand %p2063_p8, %p1676_p7 }
  0x21   : > { %p1679_p10 = pneg %p1678_p9 }
  0x23   : > { %p1684_p12 = pnand %p1682_p11, %p1679_p10 }
  0x25   : > { %1687 = shalt.err (!%p1684_p12)
}
  0x26   : > { %s1688_s20 = scalar_lea.vmem %s2040_s30, 256  ;;  %p1696_p4 = scmp.lt.s32.totalorder %s2040_s30, %s2040_s30 }
  0x27   : > { %p1689_p13 = scmp.ne.s32.totalorder %s2040_s30, %s1688_s20  ;;  %p1697_p5 = scmp.lt.s32.totalorder %s1688_s20, %s1688_s20 }
  0x29   : > { %p1691_p0 = pnand %p1689_p13, %p2063_p8  ;;  %p1698_p7 = por %p1697_p5, %p1696_p4 }
  0x2b   : > { %p1692_p2 = pneg %p1691_p0 }
  0x2d   : > { %p1699_p9 = pnand %p1698_p7, %p1692_p2 }
  0x2f   : > { %1702 = shalt.err (!%p1699_p9)
}
  0x30   : > { %s1950_s29 = smov 64   ;;  %s1951_s8 = smov 4  }
  0x31   : > { %1561 = dma.hbm_to_vmem [thread:$0]  (!%p2047_p6), %s2458_s2, 256, %s2040_s30, [#allocation9], %s1950_s29, %s1950_s29, %s1951_s8  }
  0x32   : > { %s2460_s3 = sld [smem:[#allocation25_spill]] }
  0x38   : > { %s1703_s15 = scalar_lea.hbm %s2460_s3, 256 }
  0x39   : > { %p1704_p5 = scmp.ne.s32.totalorder %s2460_s3, %s1703_s15  ;;  %p1710_p12 = scmp.lt.u32.totalorder %s1703_s15, %s2460_s3 }
  0x3b   : > { %p1706_p10 = pnand %p1704_p5, %p2063_p8 }
  0x3d   : > { %p1707_p11 = pneg %p1706_p10 }
  0x3f   : > { %p1712_p13 = pnand %p1710_p12, %p1707_p11 }
  0x41   : > { %1715 = shalt.err (!%p1712_p13)
}
  0x42   : > { %s1716_s30 = scalar_lea.vmem %s2051_s9, 256  ;;  %p1724_p7 = scmp.lt.s32.totalorder %s2051_s9, %s2051_s9 }
  0x43   : > { %p1717_p0 = scmp.ne.s32.totalorder %s2051_s9, %s1716_s30  ;;  %p1725_p9 = scmp.lt.s32.totalorder %s1716_s30, %s1716_s30 }
  0x45   : > { %p1719_p2 = pnand %p1717_p0, %p2063_p8  ;;  %p1726_p5 = por %p1725_p9, %p1724_p7 }
  0x47   : > { %p1720_p4 = pneg %p1719_p2 }
  0x49   : > { %p1727_p10 = pnand %p1726_p5, %p1720_p4 }
  0x4b   : > { %1730 = shalt.err (!%p1727_p10)
}
  0x4c   : > { %1564 = dma.hbm_to_vmem [thread:$0]  (!%p2047_p6), %s2460_s3, 256, %s2051_s9, [#allocation12], %s1950_s29, %s1950_s29, %s1951_s8  }
  0x4d   : > { %s2461_s4 = sld [smem:[#allocation26_spill]] }
  0x53   : > { %s1731_s15 = scalar_lea.hbm %s2461_s4, 256 }
  0x54   : > { %p1732_p11 = scmp.ne.s32.totalorder %s2461_s4, %s1731_s15  ;;  %p1738_p0 = scmp.lt.u32.totalorder %s1731_s15, %s2461_s4 }
  0x56   : > { %p1734_p12 = pnand %p1732_p11, %p2063_p8 }
  0x58   : > { %p1735_p13 = pneg %p1734_p12 }
  0x5a   : > { %p1740_p2 = pnand %p1738_p0, %p1735_p13 }
  0x5c   : > { %1743 = shalt.err (!%p1740_p2)
}
  0x5d   : > { %s1744_s30 = scalar_lea.vmem %s249_s11, 256  ;;  %p1752_p5 = scmp.lt.s32.totalorder %s249_s11, %s249_s11 }
  0x5e   : > { %p1745_p4 = scmp.ne.s32.totalorder %s249_s11, %s1744_s30  ;;  %p1753_p10 = scmp.lt.s32.totalorder %s1744_s30, %s1744_s30 }
  0x60   : > { %p1747_p7 = pnand %p1745_p4, %p2063_p8  ;;  %p1754_p1 = por %p1753_p10, %p1752_p5 }
  0x62   : > { %p1748_p9 = pneg %p1747_p7 }
  0x64   : > { %p1755_p3 = pnand %p1754_p1, %p1748_p9 }
  0x66   : > { %1758 = shalt.err (!%p1755_p3)
}
  0x67   : > { %1567 = dma.hbm_to_vmem [thread:$0]  (!%p2047_p6), %s2461_s4, 256, %s249_s11, [#allocation12], %s1950_s29, %s1950_s29, %s1951_s8  }
  0x68   : > { %s1952_s12 = smov [#allocation14]   ;;  %s2462_s5 = sld [smem:[#allocation27_spill]] }
  0x69   : > { %s262_s13 = sshll.u32 %s1952_s12, 4  ;;  %s263_s13 = int_to_ptr.vmem [resolvable:$true] %s262_s13 }
  0x6e   : > { %s1759_s16 = scalar_lea.hbm %s2462_s5, 16 }
  0x6f   : > { %p1760_p1 = scmp.ne.s32.totalorder %s2462_s5, %s1759_s16  ;;  %p1766_p12 = scmp.lt.u32.totalorder %s1759_s16, %s2462_s5 }
  0x71   : > { %p1762_p3 = pnand %p1760_p1, %p2063_p8 }
  0x73   : > { %p1763_p11 = pneg %p1762_p3 }
  0x75   : > { %p1768_p13 = pnand %p1766_p12, %p1763_p11 }
  0x77   : > { %1771 = shalt.err (!%p1768_p13)
}
  0x78   : > { %s1772_s11 = scalar_lea.vmem %s263_s13, 16  ;;  %s1779_s29 = scalar_lea.vmem %s263_s13, 32 }
  0x79   : > { %p1773_p0 = scmp.ne.s32.totalorder %s263_s13, %s1772_s11  ;;  %p1780_p7 = scmp.lt.s32.totalorder %s263_s13, %s263_s13 }
  0x7a   : > { %p1781_p9 = scmp.lt.s32.totalorder %s1779_s29, %s1772_s11 }
  0x7b   : > { %p1775_p2 = pnand %p1773_p0, %p2063_p8 }
  0x7c   : > { %p1782_p5 = por %p1781_p9, %p1780_p7 }
  0x7d   : > { %p1776_p4 = pneg %p1775_p2 }
  0x7f   : > { %p1783_p10 = pnand %p1782_p5, %p1776_p4 }
  0x81   : > { %1786 = shalt.err (!%p1783_p10)
}
  0x82   : > { %1570 = dma.hbm_to_vmem [thread:$0]  (!%p2047_p6), %s2462_s5, 16, %s263_s13, [#allocation15]  }
  0x83   : > { %s1359_s17 = sadd.s32 4294967294, %s1945_s26   ;;  %s39_s10 = sadd.s32 1, %s1941_s25 }
  0x84   : > { %p41_p8 = scmp.ge.s32.totalorder %s39_s10, 2  ;;  %s46_s7 = sadd.s32 1, %s1933_s23 }
  0x85   : > { %p53_p1 = scmp.ne.s32.totalorder %s1933_s23, %s1929_s22  ;;  %p54_p3 = scmp.eq.s32.totalorder %s1945_s26, 0 }
  0x86   : > { %s2488_s10 = smov (%p41_p8, %s39_s10), 0  ;;  %p59_p12 = scmp.ne.s32.totalorder %s1929_s22, %s1925_s21 }
  0x87   : > { %2463 = sst [smem:[#allocation23_spill]] %s2488_s10  ;;  %p2161_p11 = por %p54_p3, %p53_p1 }
  0x88   : > { %s43_s13 = ssub.s32 %s1941_s25, %s2488_s10  ;;  %p197_p6 = scmp.eq.s32.totalorder %s2031_s27, 1 }
  0x89   : > { %p44_p13 = scmp.eq.s32.totalorder %s43_s13, 0  ;;  %p2465_p0 = scmp.eq.s32.totalorder %s2031_s27, 0 }
  0x8a   : > { %p2176_p4 = por %p197_p6, %p53_p1  ;;  %p203_p7 = scmp.eq.s32.totalorder %s1359_s17, 1 }
  0x8b   : > { %p2172_p2 = por %p2465_p0, %p59_p12  ;;  %p1586_p5 = scmp.lt.s32.totalorder %s1945_s26, 2 }
  0x8c   : > { %s2467_s15 = scalar_select %p2176_p4, 1, 0 }
  0x8d   : > { %s2466_s14 = scalar_select %p2172_p2, 1, 0 }
  0x8e   : > { %s2181_s16 = scalar_select %p44_p13, %s1933_s23, %s46_s7  }
  0x8f   : > { %p2183_p9 = por %p203_p7, %p59_p12  ;;  %s273_s19 = sand.u32 1, %s1933_s23  }
  0x90   : > { %s1367_s20 = sshll.u32 %s1941_s25, 6  ;;  %s2190_s30 = sshll.u32 %s273_s19, 2 }
  0x91   : > { %s2468_s18 = scalar_select %p2183_p9, 1, 0 }
  0x92   : > { %s2195_s8 = scalar_lea.hbm %s2440_s0, %s1367_s20  ;;  %s277_s9 = scalar_lea.vmem [#allocation5], %s2190_s30 }
  0x93   : > { %s284_s17 = sshll.u32 %s277_s9, 4  ;;  %p2200_p10 = pnand %p1586_p5, %p2161_p11  ;;  %s2204_s17 = int_to_ptr.vmem [resolvable:$true] %s284_s17 }
  0x94   : > { %s2209_s29 = scalar_lea.hbm %s2441_s1, %s1367_s20  ;;  %s274_s2 = scalar_lea.sflag [#allocation6], %s273_s19 }
  0x95   : > { %s1787_s3 = scalar_lea.hbm %s2195_s8, 64  ;;  %p1789_p1 = pneg %p2200_p10 }
  0x96   : > { %p1788_p8 = scmp.ne.s32.totalorder %s2195_s8, %s1787_s3  ;;  %s1792_s4 = scalar_lea.hbm %s2440_s0, 128 }
  0x97   : > { %p1793_p12 = scmp.lt.u32.totalorder %s2195_s8, %s2440_s0  ;;  %p1794_p6 = scmp.lt.u32.totalorder %s1792_s4, %s1787_s3 }
  0x98   : > { %p1790_p3 = pnand %p1789_p1, %p1788_p8  ;;  %p1796_p0 = scmp.lt.u32.totalorder %s1787_s3, %s2195_s8 }
  0x99   : > { %p1795_p13 = por %p1794_p6, %p1793_p12 }
  0x9a   : > { %p1791_p11 = pneg %p1790_p3 }
  0x9b   : > { %p1797_p7 = por %p1796_p0, %p1795_p13 }
  0x9d   : > { %p1798_p5 = pnand %p1797_p7, %p1791_p11 }
  0x9f   : > { %1801 = shalt.err (!%p1798_p5)
}
  0xa0   : > { %s1802_s19 = scalar_lea.vmem %s2204_s17, 64  ;;  %s1953_s20 = smov [#allocation5]  }
  0xa1   : > { %p1803_p8 = scmp.ne.s32.totalorder %s2204_s17, %s1802_s19  ;;  %s1807_s13 = sshll.u32 %s1953_s20, 4  ;;  %s1808_s13 = int_to_ptr.vmem [resolvable:$false] %s1807_s13 }
  0xa2   : > { %s1809_s5 = scalar_lea.vmem %s1808_s13, 128  ;;  %p1810_p4 = scmp.lt.s32.totalorder %s2204_s17, %s1808_s13 }
  0xa3   : > { %p1805_p3 = pnand %p1803_p8, %p1789_p1  ;;  %p1811_p12 = scmp.lt.s32.totalorder %s1809_s5, %s1802_s19 }
  0xa5   : > { %p1806_p9 = pneg %p1805_p3  ;;  %p1812_p6 = por %p1811_p12, %p1810_p4 }
  0xa7   : > { %p1813_p13 = pnand %p1812_p6, %p1806_p9 }
  0xa9   : > { %1816 = shalt.err (!%p1813_p13)
}
  0xaa   : > { %1574 = dma.hbm_to_vmem [thread:$0]  (!%p2200_p10), %s2195_s8, 64, %s2204_s17, %s274_s2  }
  0xab   : > { %s291_s3 = sand.u32 1, %s1945_s26   ;;  %s295_s4 = scalar_lea.vmem [#allocation8], %s2190_s30 }
  0xac   : > { %s303_s10 = sshll.u32 %s295_s4, 4  ;;  %s292_s11 = scalar_lea.sflag [#allocation9], %s291_s3  ;;  %s304_s10 = int_to_ptr.vmem [resolvable:$true] %s303_s10 }
  0xad   : > { %s1817_s12 = scalar_lea.hbm %s2209_s29, 64  ;;  %s1822_s20 = scalar_lea.hbm %s2441_s1, 128 }
  0xae   : > { %p1818_p4 = scmp.ne.s32.totalorder %s2209_s29, %s1817_s12  ;;  %p1823_p0 = scmp.lt.u32.totalorder %s2209_s29, %s2441_s1 }
  0xaf   : > { %p1824_p7 = scmp.lt.u32.totalorder %s1822_s20, %s1817_s12  ;;  %p1826_p8 = scmp.lt.u32.totalorder %s1817_s12, %s2209_s29 }
  0xb0   : > { %p1820_p9 = pnand %p1818_p4, %p1789_p1 }
  0xb1   : > { %p1825_p5 = por %p1824_p7, %p1823_p0 }
  0xb2   : > { %p1821_p11 = pneg %p1820_p9 }
  0xb3   : > { %p1827_p3 = por %p1826_p8, %p1825_p5 }
  0xb5   : > { %p1828_p12 = pnand %p1827_p3, %p1821_p11 }
  0xb7   : > { %1831 = shalt.err (!%p1828_p12)
}
  0xb8   : > { %s1832_s2 = scalar_lea.vmem %s304_s10, 64  ;;  %s1954_s30 = smov [#allocation8]  }
  0xb9   : > { %p1833_p6 = scmp.ne.s32.totalorder %s304_s10, %s1832_s2  ;;  %s1837_s8 = sshll.u32 %s1954_s30, 4  ;;  %s1838_s8 = int_to_ptr.vmem [resolvable:$false] %s1837_s8 }
  0xba   : > { %s1839_s17 = scalar_lea.vmem %s1838_s8, 128  ;;  %p1840_p9 = scmp.lt.s32.totalorder %s304_s10, %s1838_s8 }
  0xbb   : > { %p1835_p13 = pnand %p1833_p6, %p1789_p1  ;;  %p1841_p2 = scmp.lt.s32.totalorder %s1839_s17, %s1832_s2 }
  0xbd   : > { %p1836_p4 = pneg %p1835_p13  ;;  %p1842_p0 = por %p1841_p2, %p1840_p9 }
  0xbf   : > { %p1843_p7 = pnand %p1842_p0, %p1836_p4 }
  0xc1   : > { %1846 = shalt.err (!%p1843_p7)
}
  0xc2   : > { %1577 = dma.hbm_to_vmem [thread:$0]  (!%p2200_p10), %s2209_s29, 64, %s304_s10, %s292_s11  }
  0xc3   : > { %p2470_p11 = scmp.ne.s32.totalorder %s2456_s28, 0 }
  0xc4   : > { %s2260_s3 = sand.u32 (!%p2470_p11), 1, %s1929_s22   ;;  %p2471_p1 = scmp.ne.s32.totalorder (!%p2470_p11), %s2466_s14, 0 }
  0xc5   : > { %312 = sbr.rel (%p2470_p11) target bundleno = 1412 (0x584), region = 44  ;;  %s1371_s4 = sshll.u32 (!%p2470_p11), %s2260_s3, 2 }
  0xc6   : > { %s315_s12 = scalar_lea.sflag (!%p2470_p11), [#allocation6], %s2260_s3  ;;  %s318_s9 = scalar_lea.vmem (!%p2470_p11), [#allocation5], %s1371_s4 }
  0xcc   : > { %1900 = dma.done.wait (%p2471_p1), %s315_s12, 64  }
  0xcd   : > { %1902 = vsyncadd (%p2471_p1), %s315_s12, 4294967232  ;;  %s323_s7 = sand.u32 1, %s2031_s27   ;;  %s327_s28 = scalar_lea.vmem [#allocation8], %s1371_s4 }
  0xce   : > { %s324_s29 = scalar_lea.sflag [#allocation9], %s323_s7 }
  0xcf   : > { %1904 = dma.done.wait (%p2471_p1), %s324_s29, 64  }
  0xd0   : > { %1906 = vsyncadd (%p2471_p1), %s324_s29, 4294967232  ;;  %p2472_p2 = scmp.eq.s32.totalorder %s2031_s27, 0 }
  0xd2   : > { %1908 = dma.done.wait (%p2472_p2), [#allocation9], 256   ;;  %p2473_p10 = pmov %p2472_p2 }
  0xd3   : > { %p2474_p5 = pmov %p2472_p2 }
  0xd4   : > { %1910 = vsyncadd (%p2473_p10), [#allocation9], 4294967040 }
  0xd5   : > { %1912 = dma.done.wait (%p2474_p5), [#allocation12], 512   ;;  %p2475_p8 = pmov %p2472_p2 }
  0xd6   : > { %p2476_p3 = pmov %p2472_p2 }
  0xd7   : > { %1914 = vsyncadd (%p2475_p8), [#allocation12], 4294966784 }
  0xd8   : > { %1916 = dma.done.wait (%p2476_p3), [#allocation15], 16   ;;  %p2477_p12 = pmov %p2472_p2 }
  0xd9   : > { %v1955_v0 = vmov 0.0   ;;  %vm1956_vm0 = vmmov 0   ;;  %v1655_v1 = vld [vmem:[#allocation11] sm:$0xff]   ;;  %v1656_v2 = vld [vmem:[#allocation11 + $0x8] sm:$0xff]   ;;  %vm399_vm1 = vcmask 261120   ;;  %v1657_v4 = vld [vmem:[#allocation10] sm:$0xff]  }
  0xda   : > { %1918 = vsyncadd (%p2477_p12), [#allocation15], 4294967280  ;;  %1435 = vmatprep.subr.bf16.mxu1 %v1955_v0  ;;  %1439 = vmatprep.mubr.msk.bf16.mxu1 %vm1956_vm0, %v1955_v0  ;;  %v382_v3 = vld [vmem:[%s318_s9] sm:$0xf]  ;;  %v1658_v5 = vld [vmem:[#allocation10 + $0x8] sm:$0xff]   ;;  %vm444_vm2 = vcmask 60416  }
  0xdb   : > { %1463 = vmatprep.subr.bf16.mxu0 %v1955_v0  ;;  %1465 = vmatprep.mubr.msk.bf16.mxu0 %vm1956_vm0, %v1955_v0  ;;  %v483_v6 = vld [vmem:[%s327_s28] sm:$0xf]  ;;  %s1957_s27 = smov 112   ;;  %s1958_s14 = smov 120   ;;  %vm577_vm3 = vcmask 64512   ;;  %vm805_vm4 = vcmask 1043456  }
  0xdc   : > { %1436 = vmatpush3.bf16.msra.mxu1 %v1655_v1  ;;  %s1959_s10 = smov 104   ;;  %s1960_s11 = smov 88  }
  0xdd   : > { %1437 = vmatprep.subr.bf16.mxu1 %v1955_v0  ;;  %s1961_s19 = smov 96   ;;  %s1962_s20 = smov 80  }
  0xde   : > { %s1963_s13 = smov 72   ;;  %s1377_s5 = sshll.u32 %s2260_s3, 3 }
  0xdf   : > { %s1400_s2 = sshll.u32 %s1937_s24, 7  ;;  %s376_s30 = scalar_lea.vmem [#allocation16], %s1377_s5 }
  0xe0   : > { %1438 = vmatpush3.bf16.msra.mxu1 %v1656_v2  ;;  %s1217_s8 = sshll.u32 %s376_s30, 4  ;;  %s2390_s12 = scalar_lea.hbm %s2446_s6, %s1400_s2  ;;  %s2392_s8 = int_to_ptr.vmem [resolvable:$true] %s1217_s8 }
  0xe1   : > { %1443 = vmatprep.subr.bf16.mxu1 %v1955_v0  ;;  %s1203_s24 = scalar_lea.sflag [#allocation7], %s2260_s3  ;;  %s1847_s9 = scalar_lea.vmem %s2392_s8, 128 }
  0xe2   : > { %p1848_p6 = scmp.ne.s32.totalorder %s2392_s8, %s1847_s9  ;;  %p2478_p13 = scmp.ne.s32.totalorder %s2467_s15, 0 }
  0xe3   : > { %1440 = vmatmul.mubr.msk.bf16.vlgmr.msra.gmra.mrb[0].mxu1 %vm399_vm1, %v382_v3  ;;  %s1964_s7 = smov [#allocation16]  }
  0xe4   : > { %1444 = vmatpush3.bf16.msra.mxu1 %v1657_v4  ;;  %1447 = vmatprep.mubr.msk.bf16.mxu1 %vm1956_vm0, %v1955_v0  ;;  %p1849_p4 = pnand %p1848_p6, %p2478_p13  ;;  %s1851_s29 = sshll.u32 %s1964_s7, 4  ;;  %s1852_s29 = int_to_ptr.vmem [resolvable:$false] %s1851_s29 }
  0xe5   : > { %1445 = vmatprep.subr.bf16.mxu1 %v1955_v0  ;;  %s1853_s28 = scalar_lea.vmem %s1852_s29, 256  ;;  %p1854_p0 = scmp.lt.s32.totalorder %s2392_s8, %s1852_s29 }
  0xe6   : > { %p1850_p9 = pneg %p1849_p4  ;;  %p1855_p7 = scmp.lt.s32.totalorder %s1853_s28, %s1847_s9 }
  0xe8   : > { %1446 = vmatpush3.bf16.msra.mxu1 %v1658_v5  ;;  %p1856_p11 = por %p1855_p7, %p1854_p0 }
  0xe9   : > { %1451 = vmatprep.subr.bf16.mxu1 %v1955_v0 }
  0xea   : > { %p1857_p1 = pnand %p1856_p11, %p1850_p9 }
  0xeb   : > { %1448 = vmatmul.mubr.msk.bf16.vlgmr.msra.gmra.mrb[4].mxu1 %vm399_vm1, %v483_v6 }
  0xec   : > { %1453 = vmatprep.mubr.msk.bf16.mxu1 %vm1956_vm0, %v1955_v0 }
 0x1b6   : > { %v437_v7 = vpop.f32.mrb[0].mxu1 }
 0x1b7   : > { %v2301_v8 = vpack.c.bf16 %v437_v7, %v437_v7  ;;  %v1441_v9 = vpop.f32.mrb[1].mxu1 }
 0x1b8   : > { %v440_v10 = vpop.f32.mrb[2].mxu1 }
 0x1b9   : > { %445 = vst.msk [vmem:[#allocation3] sm:$0xf] %vm444_vm2, %v2301_v8  ;;  %463 = vrot.lane.b32.xlu1 %v2301_v8, %s1957_s27  ;;  %453 = vrot.lane.b32.xlu0 %v2301_v8, %s1958_s14  ;;  %v1442_v11 = vpop.f32.mrb[3].mxu1 }
 0x1be   : > { %v538_v12 = vpop.f32.mrb[4].mxu1 }
 0x1bf   : > { %v544_v13 = vpack.c.bf16 %v538_v12, %v538_v12  ;;  %v1449_v14 = vpop.f32.mrb[5].mxu1 }
 0x1c0   : > { %v541_v15 = vpop.f32.mrb[6].mxu1  ;;  %v569_v16 = vld [vmem:[#allocation3] sm:$0xf] }
 0x1c1   : > { %546 = vst.msk [vmem:[#allocation2] sm:$0xf] %vm444_vm2, %v544_v13  ;;  %555 = vrot.lane.b32.xlu1 %v544_v13, %s1957_s27  ;;  %550 = vrot.lane.b32.xlu0 %v544_v13, %s1958_s14  ;;  %v1450_v17 = vpop.f32.mrb[7].mxu1  ;;  %v582_v18 = vsel %vm577_vm3, %v569_v16, 0 }
 0x1c2   : > { %1452 = vmatpush3.bf16.xpose.msra.mxu1 %v582_v18 }
 0x1c3   : > { %1457 = vmatprep.subr.bf16.mxu1 %v1955_v0 }
 0x1c5   : > { %560 = vrot.lane.b32.xlu1 %v544_v13, %s1959_s10  ;;  %473 = vrot.lane.b32.xlu0 %v2301_v8, %s1959_s10 }
 0x1c8   : > { %v565_v19 = vld [vmem:[#allocation2] sm:$0xf] }
 0x1c9   : > { %458 = vrot.lane.b32.xlu1 %v2301_v8, %s1960_s11  ;;  %1454 = vmatmul.mubr.msk.bf16.vlgmr.msra.gmra.mrb[8].mxu1 %vm577_vm3, %v565_v19 }
 0x1ca   : > { %1459 = vmatprep.mubr.msk.bf16.mxu1 %vm1956_vm0, %v1955_v0 }
 0x22b   : > { %v464_v20 = vpop.permute.xlu1 %463  ;;  %v454_v21 = vpop.permute.xlu0 %453 }
 0x22c   : > { %467 = vst.msk [vmem:[#allocation3 + $0x8] sm:$0xf] %vm444_vm2, %v464_v20  ;;  %457 = vst.msk [vmem:[#allocation3 + $0x4] sm:$0xf] %vm444_vm2, %v454_v21  ;;  %v1000_v20 = vld [vmem:[#allocation13] sm:$0xf] }
 0x233   : > { %v556_v22 = vpop.permute.xlu1 %555  ;;  %v551_v23 = vpop.permute.xlu0 %550  ;;  %v570_v24 = vld [vmem:[#allocation3 + $0x4] sm:$0xf]  ;;  %v571_v25 = vld [vmem:[#allocation3 + $0x8] sm:$0xf] }
 0x234   : > { %559 = vst.msk [vmem:[#allocation2 + $0x8] sm:$0xf] %vm444_vm2, %v556_v22  ;;  %554 = vst.msk [vmem:[#allocation2 + $0x4] sm:$0xf] %vm444_vm2, %v551_v23  ;;  %v628_v26 = vsel %vm577_vm3, %v570_v24, 0  ;;  %v674_v27 = vsel %vm577_vm3, %v571_v25, 0 }
 0x235   : > { %1458 = vmatpush3.bf16.xpose.msra.mxu1 %v628_v26  ;;  %1464 = vmatpush3.bf16.xpose.msra.mxu0 %v674_v27  ;;  %v1005_v25 = vsel %vm805_vm4, %v1000_v20, 0 }
 0x236   : > { %1469 = vmatprep.subr.bf16.mxu1 %v1955_v0  ;;  %1475 = vmatprep.subr.bf16.mxu0 %v1955_v0 }
 0x237   : > { %v561_v28 = vpop.permute.xlu1 %560  ;;  %v474_v29 = vpop.permute.xlu0 %473 }
 0x238   : > { %564 = vst.msk [vmem:[#allocation2 + $0xc] sm:$0xf] %vm444_vm2, %v561_v28  ;;  %477 = vst.msk [vmem:[#allocation3 + $0xc] sm:$0xf] %vm444_vm2, %v474_v29 }
 0x23b   : > { %v459_v30 = vpop.permute.xlu1 %458  ;;  %v566_v31 = vld [vmem:[#allocation2 + $0x4] sm:$0xf]  ;;  %v567_v32 = vld [vmem:[#allocation2 + $0x8] sm:$0xf] }
 0x23c   : > { %462 = vst.msk [vmem:[#allocation4 + $0x4] sm:$0xf] %vm444_vm2, %v459_v30  ;;  %1460 = vmatmul.mubr.msk.bf16.vlgmr.msra.gmra.mrb[12].mxu1 %vm577_vm3, %v566_v31  ;;  %1466 = vmatmul.mubr.msk.bf16.vlgmr.msra.gmra.mrb[0].mxu0 %vm577_vm3, %v567_v32 }
 0x23d   : > { %1471 = vmatprep.mubr.msk.bf16.mxu1 %vm1956_vm0, %v1955_v0  ;;  %1477 = vmatprep.mubr.msk.bf16.mxu0 %vm1956_vm0, %v1955_v0 }
 0x23f   : > { %v572_v33 = vld [vmem:[#allocation3 + $0xc] sm:$0xf]  ;;  %v568_v36 = vld [vmem:[#allocation2 + $0xc] sm:$0xf] }
 0x240   : > { %v720_v34 = vsel %vm577_vm3, %v572_v33, 0  ;;  %v1051_v33 = vld [vmem:[#allocation13 + $0x4] sm:$0xf] }
 0x241   : > { %1470 = vmatpush3.bf16.xpose.msra.mxu1 %v720_v34 }
 0x242   : > { %1481 = vmatprep.subr.bf16.mxu1 %v1955_v0 }
 0x243   : > { %v574_v35 = vld [vmem:[#allocation4 + $0x4] sm:$0xf] }
 0x244   : > { %v853_v37 = vsel %vm805_vm4, %v574_v35, 0 }
 0x248   : > { %1472 = vmatmul.mubr.msk.bf16.vlgmr.msra.gmra.mrb[16].mxu1 %vm577_vm3, %v568_v36 }
 0x249   : > { %1482 = vmatpush3.bf16.msra.mxu1 %v853_v37  ;;  %1483 = vmatprep.mubr.msk.bf16.mxu1 %vm1956_vm0, %v1955_v0 }
 0x24a   : > { %1493 = vmatprep.subr.bf16.mxu1 %v1955_v0 }
 0x29c   : > { %v618_v38 = vpop.f32.mrb[8].mxu1 }
 0x29d   : > { %v1455_v39 = vpop.f32.mrb[9].mxu1  ;;  %v762_v40 = vsel %vm577_vm3, %v618_v38, -inf }
 0x29e   : > { %763 = vmax.xlane.f32.xlu0 %v762_v40  ;;  %v621_v41 = vpop.f32.mrb[10].mxu1  ;;  %v1056_v39 = vsel %vm805_vm4, %v1051_v33, 0 }
 0x29f   : > { %v1456_v42 = vpop.f32.mrb[11].mxu1 }
 0x2b4   : > { %449 = vrot.lane.b32.xlu0 %v2301_v8, %s1961_s19 }
 0x30f   : > { %v664_v43 = vpop.f32.mrb[12].mxu1  ;;  %v710_v44 = vpop.f32.mrb[0].mxu0 }
 0x310   : > { %v1461_v45 = vpop.f32.mrb[13].mxu1  ;;  %v1467_v46 = vpop.f32.mrb[1].mxu0  ;;  %v765_v47 = vsel %vm577_vm3, %v664_v43, -inf  ;;  %v768_v52 = vsel %vm577_vm3, %v710_v44, -inf }
 0x311   : > { %v713_v48 = vpop.f32.mrb[2].mxu0  ;;  %766 = vmax.xlane.f32.xlu1 %v765_v47  ;;  %v667_v49 = vpop.f32.mrb[14].mxu1 }
 0x312   : > { %v1462_v50 = vpop.f32.mrb[15].mxu1  ;;  %v1468_v51 = vpop.f32.mrb[3].mxu0 }
 0x315   : > { %769 = vmax.xlane.f32.xlu1 %v768_v52 }
 0x31b   : > { %v756_v53 = vpop.f32.mrb[16].mxu1 }
 0x31c   : > { %v1473_v54 = vpop.f32.mrb[17].mxu1  ;;  %v771_v55 = vsel %vm577_vm3, %v756_v53, -inf }
 0x31d   : > { %772 = vmax.xlane.f32.xlu0 %v771_v55  ;;  %v759_v56 = vpop.f32.mrb[18].mxu1 }
 0x31e   : > { %v1474_v57 = vpop.f32.mrb[19].mxu1 }
 0x326   : > { %468 = vrot.lane.b32.xlu1 %v2301_v8, %s1962_s20 }
 0x32a   : > { %478 = vrot.lane.b32.xlu1 %v2301_v8, %s1963_s13 }
 0x32b   : > { %v764_v58 = vpop.xlane.xlu0 %763 }
 0x32c   : > { %v774_v59 = vsub.f32 %v618_v38, %v764_v58 }
 0x32e   : > { %v778_v60 = vmul.f32 1.442695, %v774_v59  ;;  %v1153_v59 = vld [vmem:[#allocation13 + $0xc] sm:$0xf] }
 0x32f   : > { %v450_v61 = vpop.permute.xlu0 %449 }
 0x330   : > { %1659 = vpow2.f32 %v778_v60  ;;  %452 = vst.msk [vmem:[#allocation4] sm:$0xf] %vm444_vm2, %v450_v61 }
 0x337   : > { %v573_v62 = vld [vmem:[#allocation4] sm:$0xf] }
 0x338   : > { %v807_v63 = vsel %vm805_vm4, %v573_v62, 0 }
 0x339   : > { %1476 = vmatpush3.bf16.msra.mxu0 %v807_v63 }
 0x33a   : > { %v1660_v1 = vpop.eup %1659  ;;  %1487 = vmatprep.subr.bf16.mxu0 %v1955_v0 }
 0x33b   : > { %v798_v2 = vpack.c.bf16 %v1660_v1, %v1660_v1  ;;  %v786_v3 = vsel %vm577_vm3, %v1660_v1, 0.0  ;;  %v1158_v1 = vsel %vm805_vm4, %v1153_v59, 0 }
 0x33d   : > { %1478 = vmatmul.mubr.msk.bf16.vlgmr.msra.gmra.mrb[4].mxu0 %vm577_vm3, %v798_v2 }
 0x33e   : > { %1489 = vmatprep.mubr.msk.bf16.mxu0 %vm1956_vm0, %v1955_v0 }
 0x34e   : > { %787 = vadd.xlane.f32.xlu1 %v786_v3 }
 0x39e   : > { %v767_v4 = vpop.xlane.xlu1 %766 }
 0x39f   : > { %v775_v5 = vsub.f32 %v664_v43, %v767_v4 }
 0x3a1   : > { %v780_v6 = vmul.f32 1.442695, %v775_v5  ;;  %v1394_v5 = vld [vmem:[#allocation14] ss:$0 sm:$0xff] }
 0x3a2   : > { %v770_v7 = vpop.xlane.xlu1 %769 }
 0x3a3   : > { %1661 = vpow2.f32 %v780_v6  ;;  %v776_v8 = vsub.f32 %v710_v44, %v770_v7  ;;  %v1102_v44 = vld [vmem:[#allocation13 + $0x8] sm:$0xf] }
 0x3a4   : > { %v1107_v50 = vsel %vm805_vm4, %v1102_v44, 0 }
 0x3a5   : > { %v782_v9 = vmul.f32 1.442695, %v776_v8 }
 0x3a6   : > { %v469_v10 = vpop.permute.xlu1 %468 }
 0x3a7   : > { %1663 = vpow2.f32 %v782_v9  ;;  %472 = vst.msk [vmem:[#allocation4 + $0x8] sm:$0xf] %vm444_vm2, %v469_v10 }
 0x3aa   : > { %v479_v11 = vpop.permute.xlu1 %478  ;;  %v773_v12 = vpop.xlane.xlu0 %772 }
 0x3ab   : > { %482 = vst.msk [vmem:[#allocation4 + $0xc] sm:$0xf] %vm444_vm2, %v479_v11  ;;  %v777_v13 = vsub.f32 %v756_v53, %v773_v12 }
 0x3ad   : > { %v1662_v14 = vpop.eup %1661  ;;  %v784_v15 = vmul.f32 1.442695, %v777_v13 }
 0x3ae   : > { %v789_v16 = vsel %vm577_vm3, %v1662_v14, 0.0  ;;  %v799_v17 = vpack.c.bf16 %v1662_v14, %v1662_v14  ;;  %v575_v18 = vld [vmem:[#allocation4 + $0x8] sm:$0xf] }
 0x3af   : > { %1665 = vpow2.f32 %v784_v15  ;;  %790 = vadd.xlane.f32.xlu0 %v789_v16  ;;  %v899_v19 = vsel %vm805_vm4, %v575_v18, 0 }
 0x3b0   : > { %1484 = vmatmul.mubr.msk.bf16.vlgmr.msra.gmra.mrb[20].mxu1 %vm577_vm3, %v799_v17  ;;  %1488 = vmatpush3.bf16.msra.mxu0 %v899_v19 }
 0x3b1   : > { %v1664_v21 = vpop.eup %1663  ;;  %1495 = vmatprep.mubr.msk.bf16.mxu1 %vm1956_vm0, %v1955_v0  ;;  %1499 = vmatprep.subr.bf16.mxu0 %v1955_v0 }
 0x3b2   : > { %v792_v22 = vsel %vm577_vm3, %v1664_v21, 0.0  ;;  %v800_v23 = vpack.c.bf16 %v1664_v21, %v1664_v21  ;;  %v576_v24 = vld [vmem:[#allocation4 + $0xc] sm:$0xf] }
 0x3b3   : > { %793 = vadd.xlane.f32.xlu0 %v792_v22  ;;  %v945_v26 = vsel %vm805_vm4, %v576_v24, 0 }
 0x3b4   : > { %1490 = vmatmul.mubr.msk.bf16.vlgmr.msra.gmra.mrb[8].mxu0 %vm577_vm3, %v800_v23  ;;  %1494 = vmatpush3.bf16.msra.mxu1 %v945_v26 }
 0x3b5   : > { %1500 = vmatpush3.bf16.msra.mxu0 %v1005_v25  ;;  %1501 = vmatprep.mubr.msk.bf16.mxu0 %vm1956_vm0, %v1955_v0 }
 0x3b6   : > { %1505 = vmatprep.subr.bf16.mxu0 %v1955_v0 }
 0x3b9   : > { %v1666_v27 = vpop.eup %1665 }
 0x3ba   : > { %v795_v28 = vsel %vm577_vm3, %v1666_v27, 0.0  ;;  %v801_v29 = vpack.c.bf16 %v1666_v27, %v1666_v27 }
 0x3bb   : > { %796 = vadd.xlane.f32.xlu0 %v795_v28 }
 0x3bc   : > { %1496 = vmatmul.mubr.msk.bf16.vlgmr.msra.gmra.mrb[24].mxu1 %vm577_vm3, %v801_v29 }
 0x3db   : > { %v788_v30 = vpop.xlane.xlu1 %787 }
 0x3dc   : > { %1667 = vrcp.f32 %v788_v30 }
 0x3e6   : > { %v1668_v31 = vpop.eup %1667 }
 0x410   : > { %v843_v32 = vpop.f32.mrb[4].mxu0 }
 0x411   : > { %v998_v34 = vmul.f32 %v1668_v31, %v843_v32  ;;  %v1479_v35 = vpop.f32.mrb[5].mxu0 }
 0x412   : > { %v846_v36 = vpop.f32.mrb[6].mxu0 }
 0x413   : > { %v999_v37 = vpack.c.bf16 %v998_v34, %v998_v34  ;;  %v1480_v38 = vpop.f32.mrb[7].mxu0 }
 0x415   : > { %1502 = vmatmul.mubr.msk.bf16.vlgmr.msra.gmra.mrb[12].mxu0 %vm577_vm3, %v999_v37 }
 0x416   : > { %1506 = vmatpush3.bf16.msra.mxu0 %v1056_v39  ;;  %1507 = vmatprep.mubr.msk.bf16.mxu0 %vm1956_vm0, %v1955_v0 }
 0x417   : > { %1511 = vmatprep.subr.bf16.mxu0 %v1955_v0 }
 0x43c   : > { %v791_v40 = vpop.xlane.xlu0 %790 }
 0x43d   : > { %1669 = vrcp.f32 %v791_v40 }
 0x440   : > { %v794_v41 = vpop.xlane.xlu0 %793 }
 0x441   : > { %1671 = vrcp.f32 %v794_v41 }
 0x447   : > { %v1670_v42 = vpop.eup %1669 }
 0x448   : > { %v797_v55 = vpop.xlane.xlu0 %796 }
 0x449   : > { %1673 = vrcp.f32 %v797_v55 }
 0x44b   : > { %v1672_v56 = vpop.eup %1671 }
 0x453   : > { %v1674_v2 = vpop.eup %1673 }
 0x483   : > { %v889_v43 = vpop.f32.mrb[20].mxu1 }
 0x484   : > { %v1048_v45 = vmul.f32 %v1670_v42, %v889_v43  ;;  %v1485_v46 = vpop.f32.mrb[21].mxu1 }
 0x485   : > { %v892_v47 = vpop.f32.mrb[22].mxu1 }
 0x486   : > { %v1049_v48 = vpack.c.bf16 %v1048_v45, %v1048_v45  ;;  %v1486_v49 = vpop.f32.mrb[23].mxu1 }
 0x487   : > { %v935_v51 = vpop.f32.mrb[8].mxu0 }
 0x488   : > { %v1491_v52 = vpop.f32.mrb[9].mxu0  ;;  %1508 = vmatmul.mubr.msk.bf16.vlgmr.msra.gmra.mrb[12].mxu0 %vm577_vm3, %v1049_v48  ;;  %v1099_v57 = vmul.f32 %v1672_v56, %v935_v51 }
 0x489   : > { %v938_v53 = vpop.f32.mrb[10].mxu0  ;;  %1512 = vmatpush3.bf16.msra.mxu0 %v1107_v50  ;;  %1513 = vmatprep.mubr.msk.bf16.mxu0 %vm1956_vm0, %v1955_v0 }
 0x48a   : > { %v1492_v54 = vpop.f32.mrb[11].mxu0  ;;  %1517 = vmatprep.subr.bf16.mxu0 %v1955_v0  ;;  %v1100_v62 = vpack.c.bf16 %v1099_v57, %v1099_v57 }
 0x48f   : > { %v981_v58 = vpop.f32.mrb[24].mxu1 }
 0x490   : > { %v1497_v60 = vpop.f32.mrb[25].mxu1  ;;  %v1150_v3 = vmul.f32 %v1674_v2, %v981_v58 }
 0x491   : > { %v984_v61 = vpop.f32.mrb[26].mxu1 }
 0x492   : > { %v1498_v63 = vpop.f32.mrb[27].mxu1  ;;  %v1151_v4 = vpack.c.bf16 %v1150_v3, %v1150_v3 }
 0x494   : > { %1514 = vmatmul.mubr.msk.bf16.vlgmr.msra.gmra.mrb[12].mxu0 %vm577_vm3, %v1100_v62 }
 0x495   : > { %1518 = vmatpush3.bf16.msra.mxu0 %v1158_v1  ;;  %1519 = vmatprep.mubr.msk.bf16.mxu0 %vm1956_vm0, %v1955_v0 }
 0x4a0   : > { %1520 = vmatmul.mubr.msk.bf16.vlgmr.msra.gmra.mrb[12].mxu0 %vm577_vm3, %v1151_v4 }
 0x573   : > { %v1194_v6 = vpop.f32.mrb[12].mxu0 }
 0x574   : > { %v1523_v7 = vadd.f32 %v1394_v5, %v1194_v6  ;;  %v1521_v8 = vpop.f32.mrb[13].mxu0 }
 0x575   : > { %v1197_v0 = vpop.f32.mrb[14].mxu0 }
 0x576   : > { %v1522_v9 = vpop.f32.mrb[15].mxu0  ;;  %1201 = vst.msk [vmem:[%s376_s30] sm:$0xff] %vm399_vm1, %v1523_v7 }
 0x577   : > { %1860 = shalt.err (!%p1857_p1)
}
 0x578   : > { %s1861_s3 = scalar_lea.hbm %s2390_s12, 128  ;;  %s1865_s10 = scalar_lea.hbm %s2446_s6, 256 }
 0x579   : > { %p1862_p2 = scmp.ne.s32.totalorder %s2390_s12, %s1861_s3  ;;  %p1866_p8 = scmp.lt.u32.totalorder %s2390_s12, %s2446_s6 }
 0x57a   : > { %p1867_p3 = scmp.lt.u32.totalorder %s1865_s10, %s1861_s3  ;;  %p1869_p6 = scmp.lt.u32.totalorder %s1861_s3, %s2390_s12 }
 0x57b   : > { %p1863_p10 = pnand %p1862_p2, %p2478_p13 }
 0x57c   : > { %p1868_p12 = por %p1867_p3, %p1866_p8 }
 0x57d   : > { %p1864_p5 = pneg %p1863_p10 }
 0x57e   : > { %p1870_p4 = por %p1869_p6, %p1868_p12 }
 0x580   : > { %p1871_p9 = pnand %p1870_p4, %p1864_p5 }
 0x582   : > { %1874 = shalt.err (!%p1871_p9)
}
 0x583   : > { %1556 = dma.vmem_to_hbm [thread:$0]  (%p2478_p13), %s2392_s8, 128, %s2390_s12, %s1203_s24  }
 0x584 PF: > { %s1229_s20 = sand.u32 1, %s1925_s21   ;;  %p2479_p0 = scmp.ne.s32.totalorder %s2468_s18, 0 }
 0x585   : > { %p2480_p7 = scmp.ge.s32.totalorder %s1945_s26, 2  ;;  %s1230_s13 = scalar_lea.sflag [#allocation7], %s1229_s20 }
 0x587   : > { %p1579_p11 = pnand %p2480_p7, %p2479_p0 }
 0x589   : > { %1920 = dma.done.wait (!%p1579_p11), %s1230_s13, 128  }
 0x58a   : > { %1922 = vsyncadd (!%p1579_p11), %s1230_s13, 4294967168  ;;  %s27_s26 = sadd.s32 1, %s1945_s26   ;;  %s2481_s15 = sld [smem:[#allocation23_spill]] }
 0x58b   : > { %p24_p1 = scmp.ge.s32.totalorder %s27_s26, 4   ;;  %s2482_s21 = smov %s1929_s22 }
 0x58c   : > { %s2483_s22 = smov %s1933_s23  ;;  %s2484_s23 = smov %s2181_s16 }
 0x58d   : > { %s2485_s24 = smov %s1941_s25  ;;  %26 = sbr.rel (!%p24_p1) target bundleno = 15 (0xf), region = 134 }
 0x590   : > { %s2486_s25 = smov %s2481_s15 }
 0x594   :  { %1235 = vsyncpa [#allocation6], 1 }
 0x595   :  { %1237 = vsyncpa [#allocation6 + $0x1], 1 }
 0x596   :  { %1238 = vsyncpa [#allocation9], 1 }
 0x597   :  { %1240 = vsyncpa [#allocation9 + $0x1], 1 }
 0x598   :  { %1241 = vsyncpa [#allocation12], 1 }
 0x599   :  { %1242 = vsyncpa [#allocation15], 1 }
 0x59a   :  { %1243 = vsyncpa [#allocation7], 1 }
 0x59b   :  { %1245 = vsyncpa [#allocation7 + $0x1], 1 }

</bundles_post_ra>
